<compile_context>
chip_gen: v7x
topology: tpu7x:2x2x1
jax: 0.10.0
libtpu: 0.0.40
codegen_flags: <defaults>
</compile_context>

<pallas_src>
import functools

import jax
import jax.numpy as jnp
from jax import lax
from jax.experimental import pallas as pl
from jax.experimental.pallas import tpu as pltpu


# ---------------------------------------------------------------------------
# Shared helpers
# ---------------------------------------------------------------------------

def _padded_bytes(shape, itemsize):
    """VMEM bytes of one buffer, padded to the (8, 128) register tile."""
    shape = tuple(int(d) for d in shape)
    if len(shape) == 1:
        shape = (1,) + shape
    lead = 1
    for d in shape[:-2]:
        lead *= d
    rows = -(-shape[-2] // 8) * 8
    cols = -(-shape[-1] // 128) * 128
    return lead * rows * cols * itemsize


def _vmem_limit_bytes(entries):
    """entries: iterable of (shape, itemsize, n_buffers)."""
    total = sum(n * _padded_bytes(s, i) for (s, i, n) in entries)
    # + slack; floor at the smallest default scoped limit; cap at v7x's 64 MiB.
    return int(min(max(total + (4 << 20), 16 << 20), 64 << 20))


def _sage_block(agg, x_dst_bf16, wl_ref, wr_ref, b_ref, g_ref, be_ref):
    """lin_l(agg) + lin_r(x_root) -> LayerNorm -> ReLU  (f32 epilogue).

    Two bf16 MXU dots with f32 accumulation (no lane-axis concatenate).
    Dropout(p=0.5) is identity in eval mode.
    """
    z = (jnp.dot(agg.astype(jnp.bfloat16), wl_ref[...],
                 preferred_element_type=jnp.float32)
         + jnp.dot(x_dst_bf16, wr_ref[...],
                   preferred_element_type=jnp.float32)
         + b_ref[...])
    mu = jnp.mean(z, axis=-1, keepdims=True)
    var = jnp.mean((z - mu) ** 2, axis=-1, keepdims=True)
    zn = (z - mu) * lax.rsqrt(var + 1e-5) * g_ref[...] + be_ref[...]
    # TODO(synk): Dropout(p=0.5) is identity (inference / eval mode).
    return jnp.maximum(zn, 0.0)


def _log_softmax(logits):
    m = jnp.max(logits, axis=-1, keepdims=True)
    zc = logits - m
    lse = jnp.log(jnp.sum(jnp.exp(zc), axis=-1, keepdims=True))
    return zc - lse


# ---------------------------------------------------------------------------
# Fused path: whole layer stack + classifier in ONE pallas_call (small graphs)
# ---------------------------------------------------------------------------

def _make_fused_kernel(n_layers):
    def kernel(*refs):
        adj_ref, adjr_ref, x_ref, invd_ref, invdr_ref = refs[:5]
        layer_refs = refs[5:5 + 5 * n_layers]
        wf_ref = refs[5 + 5 * n_layers]
        bf_ref = refs[6 + 5 * n_layers]
        o_ref = refs[7 + 5 * n_layers]
        h_scr = refs[8 + 5 * n_layers]

        tile_n = o_ref.shape[0]
        row0 = pl.multiple_of(pl.program_id(0) * tile_n, tile_n)

        h = x_ref[...]                                        # (N, F) f32
        for li in range(n_layers):
            wl, wr, b, g, be = layer_refs[5 * li:5 * li + 5]
            last = li == n_layers - 1
            if last:
                # Only this grid step's destination-row tile needs the last
                # layer (the other tile is handled by the other step / core).
                a_l, invd_l = adjr_ref[...], invdr_ref[...]
                if n_layers == 1:
                    x_dst = x_ref[pl.ds(row0, tile_n), :]
                else:
                    h_scr[...] = h
                    x_dst = h_scr[pl.ds(row0, tile_n), :]
            else:
                a_l, invd_l, x_dst = adj_ref[...], invd_ref[...], h

            # 'mean' aggregation: (A @ h) * 1/deg  (bf16 MXU, f32 accum/scale).
            agg = jnp.dot(a_l, h.astype(jnp.bfloat16),
                          preferred_element_type=jnp.float32) * invd_l
            h = _sage_block(agg, x_dst.astype(jnp.bfloat16), wl, wr, b, g, be)

        # Classifier + log_softmax epilogue fused into the same kernel.
        logits = (jnp.dot(h.astype(jnp.bfloat16), wf_ref[...],
                          preferred_element_type=jnp.float32) + bf_ref[...])
        o_ref[...] = _log_softmax(logits)

    return kernel


def sage_forward_fused(adj_bf, x, inv_deg, params_bf, wf_bf, b_final):
    N, F = x.shape
    H = params_bf[0][0].shape[1]
    C = wf_bf.shape[1]
    L = len(params_bf)

    # >= 2 destination tiles so both of v7x's TensorCores get work; each tile
    # stays a multiple of 16 rows (bf16 sublane packing).
    n_tiles = 2 if (N >= 64 and N % 32 == 0) else 1
    tile_n = N // n_tiles

    flat_w = []
    for (wl, wr, b, g, be) in params_bf:
        flat_w += [wl, wr, b, g, be]

    in_specs = [
        pl.BlockSpec((N, N), lambda i: (0, 0)),        # adjacency (all dst rows)
        pl.BlockSpec((tile_n, N), lambda i: (i, 0)),   # adjacency (this dst tile)
        pl.BlockSpec((N, F), lambda i: (0, 0)),        # node features
        pl.BlockSpec((N, 1), lambda i: (0, 0)),        # 1/deg (all rows)
        pl.BlockSpec((tile_n, 1), lambda i: (i, 0)),   # 1/deg (this dst tile)
    ] + [pl.BlockSpec(tuple(a.shape), lambda i: (0, 0))
         for a in flat_w + [wf_bf, b_final]]

    vmem = _vmem_limit_bytes(
        [((N, N), 2, 1), ((tile_n, N), 2, 2), ((N, F), 4, 1),
         ((N, 1), 4, 1), ((tile_n, 1), 4, 2),
         ((N, H), 4, 4),                     # scratch + live intermediates
         ((tile_n, C), 4, 2)]
        + [(tuple(a.shape), a.dtype.itemsize, 1)
           for a in flat_w + [wf_bf, b_final]])

    return pl.pallas_call(
        _make_fused_kernel(L),
        out_shape=jax.ShapeDtypeStruct((N, C), jnp.float32),
        grid_spec=pltpu.PrefetchScalarGridSpec(
            num_scalar_prefetch=0,
            grid=(n_tiles,),
            in_specs=in_specs,
            out_specs=pl.BlockSpec((tile_n, C), lambda i: (i, 0)),
            scratch_shapes=[pltpu.VMEM((N, H), jnp.float32)],
        ),
        compiler_params=pltpu.CompilerParams(
            dimension_semantics=("parallel",),
            vmem_limit_bytes=vmem,
        ),
    )(adj_bf, adj_bf, x, inv_deg, inv_deg, *flat_w, wf_bf, b_final)


# ---------------------------------------------------------------------------
# Tiled path: one pallas_call per layer with a K-tiled source-node reduction
# ---------------------------------------------------------------------------

def _sage_tiled_accumulate(a_ref, xs_ref, acc_ref):
    k = pl.program_id(1)

    @pl.when(k == 0)
    def _():
        acc_ref[...] = jnp.zeros_like(acc_ref)

    acc_ref[...] += jnp.dot(a_ref[...], xs_ref[...].astype(jnp.bfloat16),
                            preferred_element_type=jnp.float32)


def sage_layer_tiled_kernel(a_ref, xs_ref, xd_ref, invd_ref, wl_ref, wr_ref,
                            b_ref, g_ref, be_ref, o_ref, acc_ref):
    _sage_tiled_accumulate(a_ref, xs_ref, acc_ref)

    @pl.when(pl.program_id(1) == pl.num_programs(1) - 1)
    def _():
        agg = acc_ref[...] * invd_ref[...]
        o_ref[...] = _sage_block(agg, xd_ref[...].astype(jnp.bfloat16),
                                 wl_ref, wr_ref, b_ref, g_ref, be_ref)


def sage_final_tiled_kernel(a_ref, xs_ref, xd_ref, invd_ref, wl_ref, wr_ref,
                            b_ref, g_ref, be_ref, wf_ref, bf_ref, o_ref,
                            acc_ref):
    _sage_tiled_accumulate(a_ref, xs_ref, acc_ref)

    @pl.when(pl.program_id(1) == pl.num_programs(1) - 1)
    def _():
        agg = acc_ref[...] * invd_ref[...]
        h = _sage_block(agg, xd_ref[...].astype(jnp.bfloat16),
                        wl_ref, wr_ref, b_ref, g_ref, be_ref)
        logits = (jnp.dot(h.astype(jnp.bfloat16), wf_ref[...],
                          preferred_element_type=jnp.float32) + bf_ref[...])
        o_ref[...] = _log_softmax(logits)


def _pick_tiles(N):
    # TODO(synk): general N needs padding / row masking; the tiled path assumes
    # N is a multiple of 128.
    assert N % 128 == 0, "tiled path expects N % 128 == 0"
    tile_k = 512 if N % 512 == 0 else (256 if N % 256 == 0 else 128)
    # Keep >= 2 destination tiles (v7x has two TensorCores) and a footprint
    # that also fits v7x's 64 MiB VMEM.
    tile_n = 256 if (N % 256 == 0 and N // 256 >= 2) else 128
    return tile_n, tile_k


def _tiled_specs(fin, H, tile_n, tile_k):
    return [
        pl.BlockSpec((tile_n, tile_k), lambda i, k: (i, k)),  # adjacency tile (bf16)
        pl.BlockSpec((tile_k, fin), lambda i, k: (k, 0)),     # source features
        pl.BlockSpec((tile_n, fin), lambda i, k: (i, 0)),     # root (dst) features
        pl.BlockSpec((tile_n, 1), lambda i, k: (i, 0)),       # 1/deg
        pl.BlockSpec((fin, H), lambda i, k: (0, 0)),          # W_l (bf16)
        pl.BlockSpec((fin, H), lambda i, k: (0, 0)),          # W_r (bf16)
        pl.BlockSpec((1, H), lambda i, k: (0, 0)),            # b_l
        pl.BlockSpec((1, H), lambda i, k: (0, 0)),            # LN gamma
        pl.BlockSpec((1, H), lambda i, k: (0, 0)),            # LN beta
    ]


def sage_layer_tiled(adj_bf, x, inv_deg, wl, wr, b, g, be):
    N, fin = x.shape
    H = wl.shape[1]
    tile_n, tile_k = _pick_tiles(N)
    vmem = _vmem_limit_bytes(
        [((tile_n, tile_k), 2, 2), ((tile_k, fin), 4, 2), ((tile_n, fin), 4, 2),
         ((tile_n, 1), 4, 2), ((fin, H), 2, 4), ((1, H), 4, 6),
         ((tile_n, H), 4, 2), ((tile_n, fin), 4, 1)])
    return pl.pallas_call(
        sage_layer_tiled_kernel,
        out_shape=jax.ShapeDtypeStruct((N, H), jnp.float32),
        grid_spec=pltpu.PrefetchScalarGridSpec(
            num_scalar_prefetch=0,
            grid=(N // tile_n, N // tile_k),        # K (source) axis last
            in_specs=_tiled_specs(fin, H, tile_n, tile_k),
            out_specs=pl.BlockSpec((tile_n, H), lambda i, k: (i, 0)),
            scratch_shapes=[pltpu.VMEM((tile_n, fin), jnp.float32)],
        ),
        compiler_params=pltpu.CompilerParams(
            dimension_semantics=("parallel", "arbitrary"),
            vmem_limit_bytes=vmem,
        ),
    )(adj_bf, x, x, inv_deg, wl, wr, b, g, be)


def sage_final_layer_tiled(adj_bf, x, inv_deg, wl, wr, b, g, be, wf, bfin):
    N, fin = x.shape
    H = wl.shape[1]
    C = wf.shape[1]
    tile_n, tile_k = _pick_tiles(N)
    in_specs = _tiled_specs(fin, H, tile_n, tile_k) + [
        pl.BlockSpec((H, C), lambda i, k: (0, 0)),            # classifier W (bf16)
        pl.BlockSpec((1, C), lambda i, k: (0, 0)),            # classifier bias
    ]
    vmem = _vmem_limit_bytes(
        [((tile_n, tile_k), 2, 2), ((tile_k, fin), 4, 2), ((tile_n, fin), 4, 2),
         ((tile_n, 1), 4, 2), ((fin, H), 2, 4), ((1, H), 4, 6),
         ((H, C), 2, 2), ((1, C), 4, 2),
         ((tile_n, C), 4, 2), ((tile_n, fin), 4, 1), ((tile_n, H), 4, 1)])
    return pl.pallas_call(
        sage_final_tiled_kernel,
        out_shape=jax.ShapeDtypeStruct((N, C), jnp.float32),
        grid_spec=pltpu.PrefetchScalarGridSpec(
            num_scalar_prefetch=0,
            grid=(N // tile_n, N // tile_k),
            in_specs=in_specs,
            out_specs=pl.BlockSpec((tile_n, C), lambda i, k: (i, 0)),
            scratch_shapes=[pltpu.VMEM((tile_n, fin), jnp.float32)],
        ),
        compiler_params=pltpu.CompilerParams(
            dimension_semantics=("parallel", "arbitrary"),
            vmem_limit_bytes=vmem,
        ),
    )(adj_bf, x, x, inv_deg, wl, wr, b, g, be, wf, bfin)


# ---------------------------------------------------------------------------
# Model forward + pure-JAX reference
# ---------------------------------------------------------------------------

@functools.partial(jax.jit, static_argnames=("use_fused",))
def sage_model_forward(x, adj, layer_params, w_final, b_final, use_fused=True):
    """SAGEModel.forward (dense adjacency stand-in for SparseTensor, eval mode)."""
    adj = adj.astype(jnp.float32)
    deg = jnp.sum(adj, axis=-1, keepdims=True)
    inv_deg = 1.0 / jnp.maximum(deg, 1.0)              # 'mean' aggregation, f32
    adj_bf = adj.astype(jnp.bfloat16)                  # {0,1} exact in bf16
    # TODO(synk): store adjacency as int8 (v5e/v6e) or fp8 e4m3 (v7x) and upcast
    # in-kernel to halve HBM traffic on large graphs; bf16 is portable.

    params_bf = [(wl.astype(jnp.bfloat16), wr.astype(jnp.bfloat16), b, g, be)
                 for (wl, b, wr, g, be) in layer_params]
    wf_bf = w_final.astype(jnp.bfloat16)

    if use_fused:
        # Whole layer stack + classifier + log_softmax in ONE pallas_call.
        return sage_forward_fused(adj_bf, x, inv_deg, params_bf, wf_bf, b_final)

    # Large-graph path: one K-tiled pallas_call per layer.
    h = x
    L = len(params_bf)
    for li, (wl, wr, b, g, be) in enumerate(params_bf):
        if li == L - 1:
            h = sage_final_layer_tiled(adj_bf, h, inv_deg, wl, wr, b, g, be,
                                       wf_bf, b_final)
        else:
            h = sage_layer_tiled(adj_bf, h, inv_deg, wl, wr, b, g, be)
    return h


def sage_reference(x, adj, layer_params, w_final, b_final):
    """Pure-JAX f32 reference mirroring the PyTorch SAGEModel forward (eval)."""
    deg = jnp.sum(adj, axis=-1, keepdims=True)
    inv_deg = 1.0 / jnp.maximum(deg, 1.0)
    h = x
    for (wl, b, wr, g, be) in layer_params:
        agg = (adj @ h) * inv_deg
        z = agg @ wl + h @ wr + b
        mu = jnp.mean(z, axis=-1, keepdims=True)
        var = jnp.mean((z - mu) ** 2, axis=-1, keepdims=True)
        z = (z - mu) / jnp.sqrt(var + 1e-5) * g + be
        h = jnp.maximum(z, 0.0)
    logits = h @ w_final + b_final
    return jax.nn.log_softmax(logits, axis=-1)


# ---------------------------------------------------------------------------
# Demo
# ---------------------------------------------------------------------------

if __name__ == "__main__":
    def make_inputs(key, N, F, H, C, L):
        keys = jax.random.split(key, 2 * L + 3)
        x = jax.random.normal(keys[0], (N, F), jnp.float32)
        adj = jax.random.bernoulli(keys[1], p=0.2,
                                   shape=(N, N)).astype(jnp.float32)
        params = []
        in_c = F
        for li in range(L):
            wl = 0.1 * jax.random.normal(keys[3 + 2 * li], (in_c, H), jnp.float32)
            bl = jnp.zeros((1, H), jnp.float32)             # lin_l.bias
            wr = 0.1 * jax.random.normal(keys[4 + 2 * li], (in_c, H), jnp.float32)
            gamma = jnp.ones((1, H), jnp.float32)           # LayerNorm weight
            beta = jnp.zeros((1, H), jnp.float32)           # LayerNorm bias
            params.append((wl, bl, wr, gamma, beta))
            in_c = H
        wf = 0.1 * jax.random.normal(keys[2], (H, C), jnp.float32)
        bfin = jnp.zeros((1, C), jnp.float32)
        return x, adj, params, wf, bfin

    # Model sizes consistent with SAGEModel(num_node_features=16,
    # num_classes=8, hidden_channels=32, num_layers=2).
    F, H, C, L = 16, 32, 8, 2
    k_small, k_big = jax.random.split(jax.random.PRNGKey(0))

    # 1) Small graph — entire model fused into a single pallas_call.
    N = 64
    x, adj, params, wf, bfin = make_inputs(k_small, N, F, H, C, L)
    out = jax.block_until_ready(
        sage_model_forward(x, adj, params, wf, bfin, use_fused=True))
    assert out.shape == (N, C) and out.dtype == jnp.float32
    ref = sage_reference(x, adj, params, wf, bfin)
    assert float(jnp.max(jnp.abs(out - ref))) < 2e-1, "fused path mismatch"

    # 2) Larger graph — per-layer kernels with a K-tiled source-node reduction.
    N2 = 256
    x2, adj2, params2, wf2, bfin2 = make_inputs(k_big, N2, F, H, C, L)
    out2 = jax.block_until_ready(
        sage_model_forward(x2, adj2, params2, wf2, bfin2, use_fused=False))
    assert out2.shape == (N2, C) and out2.dtype == jnp.float32
    ref2 = sage_reference(x2, adj2, params2, wf2, bfin2)
    assert float(jnp.max(jnp.abs(out2 - ref2))) < 2e-1, "tiled path mismatch"

    print("KERNEL_OK")
</pallas_src>

<mosaic_0001>
module attributes {stable_mosaic.version = 11 : i64} {
  func.func @kernel(%arg0: i32, %arg1: memref<64x64xbf16, #tpu.memory_space<vmem>>, %arg2: memref<32x64xbf16, #tpu.memory_space<vmem>>, %arg3: memref<64x16xf32, #tpu.memory_space<vmem>>, %arg4: memref<64x1xf32, #tpu.memory_space<vmem>>, %arg5: memref<32x1xf32, #tpu.memory_space<vmem>>, %arg6: memref<16x32xbf16, #tpu.memory_space<vmem>>, %arg7: memref<16x32xbf16, #tpu.memory_space<vmem>>, %arg8: memref<1x32xf32, #tpu.memory_space<vmem>>, %arg9: memref<1x32xf32, #tpu.memory_space<vmem>>, %arg10: memref<1x32xf32, #tpu.memory_space<vmem>>, %arg11: memref<32x32xbf16, #tpu.memory_space<vmem>>, %arg12: memref<32x32xbf16, #tpu.memory_space<vmem>>, %arg13: memref<1x32xf32, #tpu.memory_space<vmem>>, %arg14: memref<1x32xf32, #tpu.memory_space<vmem>>, %arg15: memref<1x32xf32, #tpu.memory_space<vmem>>, %arg16: memref<32x8xbf16, #tpu.memory_space<vmem>>, %arg17: memref<1x8xf32, #tpu.memory_space<vmem>>, %arg18: memref<32x8xf32, #tpu.memory_space<vmem>>, %arg19: memref<64x32xf32, #tpu.memory_space<vmem>>) attributes {dimension_semantics = [#tpu.dimension_semantics<parallel>], iteration_bounds = array<i64: 2>, scalar_prefetch = 0 : i64, scratch_operands = 1 : i64, tpu.core_type = #tpu.core_type<tc>, window_params = [{pipeline_mode = #tpu.pipeline_mode<synchronous>, transform_indices = @transform_0, window_bounds = array<i64: 64, 64>}, {transform_indices = @transform_1, window_bounds = array<i64: 32, 64>}, {pipeline_mode = #tpu.pipeline_mode<synchronous>, transform_indices = @transform_2, window_bounds = array<i64: 64, 16>}, {pipeline_mode = #tpu.pipeline_mode<synchronous>, transform_indices = @transform_3, window_bounds = array<i64: 64, 1>}, {transform_indices = @transform_4, window_bounds = array<i64: 32, 1>}, {pipeline_mode = #tpu.pipeline_mode<synchronous>, transform_indices = @transform_5, window_bounds = array<i64: 16, 32>}, {pipeline_mode = #tpu.pipeline_mode<synchronous>, transform_indices = @transform_6, window_bounds = array<i64: 16, 32>}, {pipeline_mode = #tpu.pipeline_mode<synchronous>, transform_indices = @transform_7, window_bounds = array<i64: 1, 32>}, {pipeline_mode = #tpu.pipeline_mode<synchronous>, transform_indices = @transform_8, window_bounds = array<i64: 1, 32>}, {pipeline_mode = #tpu.pipeline_mode<synchronous>, transform_indices = @transform_9, window_bounds = array<i64: 1, 32>}, {pipeline_mode = #tpu.pipeline_mode<synchronous>, transform_indices = @transform_10, window_bounds = array<i64: 32, 32>}, {pipeline_mode = #tpu.pipeline_mode<synchronous>, transform_indices = @transform_11, window_bounds = array<i64: 32, 32>}, {pipeline_mode = #tpu.pipeline_mode<synchronous>, transform_indices = @transform_12, window_bounds = array<i64: 1, 32>}, {pipeline_mode = #tpu.pipeline_mode<synchronous>, transform_indices = @transform_13, window_bounds = array<i64: 1, 32>}, {pipeline_mode = #tpu.pipeline_mode<synchronous>, transform_indices = @transform_14, window_bounds = array<i64: 1, 32>}, {pipeline_mode = #tpu.pipeline_mode<synchronous>, transform_indices = @transform_15, window_bounds = array<i64: 32, 8>}, {pipeline_mode = #tpu.pipeline_mode<synchronous>, transform_indices = @transform_16, window_bounds = array<i64: 1, 8>}, {transform_indices = @transform_17, window_bounds = array<i64: 32, 8>}]} {
    %c32_i32 = arith.constant 32 : i32
    %0 = arith.muli %arg0, %c32_i32 : i32
    %1 = tpu.assume_multiple %0, 32 : i32
    %c0 = arith.constant 0 : index
    %c0_0 = arith.constant 0 : index
    %2 = vector.load %arg3[%c0, %c0_0] : memref<64x16xf32, #tpu.memory_space<vmem>>, vector<64x16xf32>
    %c0_1 = arith.constant 0 : index
    %c0_2 = arith.constant 0 : index
    %3 = vector.load %arg1[%c0_1, %c0_2] : memref<64x64xbf16, #tpu.memory_space<vmem>>, vector<64x64xbf16>
    %c0_3 = arith.constant 0 : index
    %c0_4 = arith.constant 0 : index
    %4 = vector.load %arg4[%c0_3, %c0_4] : memref<64x1xf32, #tpu.memory_space<vmem>>, vector<64x1xf32>
    %5 = arith.truncf %2 : vector<64x16xf32> to vector<64x16xbf16>
    %cst = arith.constant dense<0.000000e+00> : vector<64x16xf32>
    %6 = tpu.matmul %3, %5, %cst {dimension_numbers = #tpu.dot_dimension_numbers<[1], [0], [0], [1], [0, 0, 1, 1], [], []>} : vector<64x64xbf16>, vector<64x16xbf16>, vector<64x16xf32> -> vector<64x16xf32>
    %7 = vector.broadcast %4 : vector<64x1xf32> to vector<64x16xf32>
    %8 = arith.mulf %6, %7 : vector<64x16xf32>
    %9 = arith.truncf %2 : vector<64x16xf32> to vector<64x16xbf16>
    %10 = arith.truncf %8 : vector<64x16xf32> to vector<64x16xbf16>
    %c0_5 = arith.constant 0 : index
    %c0_6 = arith.constant 0 : index
    %11 = vector.load %arg6[%c0_5, %c0_6] : memref<16x32xbf16, #tpu.memory_space<vmem>>, vector<16x32xbf16>
    %cst_7 = arith.constant dense<0.000000e+00> : vector<64x32xf32>
    %12 = tpu.matmul %10, %11, %cst_7 {dimension_numbers = #tpu.dot_dimension_numbers<[1], [0], [0], [1], [0, 0, 1, 1], [], []>} : vector<64x16xbf16>, vector<16x32xbf16>, vector<64x32xf32> -> vector<64x32xf32>
    %c0_8 = arith.constant 0 : index
    %c0_9 = arith.constant 0 : index
    %13 = vector.load %arg7[%c0_8, %c0_9] : memref<16x32xbf16, #tpu.memory_space<vmem>>, vector<16x32xbf16>
    %cst_10 = arith.constant dense<0.000000e+00> : vector<64x32xf32>
    %14 = tpu.matmul %9, %13, %cst_10 {dimension_numbers = #tpu.dot_dimension_numbers<[1], [0], [0], [1], [0, 0, 1, 1], [], []>} : vector<64x16xbf16>, vector<16x32xbf16>, vector<64x32xf32> -> vector<64x32xf32>
    %15 = arith.addf %12, %14 : vector<64x32xf32>
    %c0_11 = arith.constant 0 : index
    %c0_12 = arith.constant 0 : index
    %16 = vector.load %arg8[%c0_11, %c0_12] : memref<1x32xf32, #tpu.memory_space<vmem>>, vector<1x32xf32>
    %17 = vector.broadcast %16 : vector<1x32xf32> to vector<64x32xf32>
    %18 = arith.addf %15, %17 : vector<64x32xf32>
    %cst_13 = arith.constant dense<0.000000e+00> : vector<64xf32>
    %19 = vector.multi_reduction <add>, %18, %cst_13 [1] : vector<64x32xf32> to vector<64xf32>
    %20 = vector.shape_cast %19 : vector<64xf32> to vector<64x1xf32>
    %cst_14 = arith.constant 3.200000e+01 : f32
    %21 = vector.broadcast %cst_14 : f32 to vector<64x1xf32>
    %22 = arith.divf %20, %21 : vector<64x1xf32>
    %23 = vector.broadcast %22 : vector<64x1xf32> to vector<64x32xf32>
    %24 = arith.subf %18, %23 : vector<64x32xf32>
    %25 = arith.mulf %24, %24 : vector<64x32xf32>
    %cst_15 = arith.constant dense<0.000000e+00> : vector<64xf32>
    %26 = vector.multi_reduction <add>, %25, %cst_15 [1] : vector<64x32xf32> to vector<64xf32>
    %27 = vector.shape_cast %26 : vector<64xf32> to vector<64x1xf32>
    %cst_16 = arith.constant 3.200000e+01 : f32
    %28 = vector.broadcast %cst_16 : f32 to vector<64x1xf32>
    %29 = arith.divf %27, %28 : vector<64x1xf32>
    %30 = vector.broadcast %22 : vector<64x1xf32> to vector<64x32xf32>
    %31 = arith.subf %18, %30 : vector<64x32xf32>
    %cst_17 = arith.constant 9.99999974E-6 : f32
    %32 = vector.broadcast %cst_17 : f32 to vector<64x1xf32>
    %33 = arith.addf %29, %32 : vector<64x1xf32>
    %34 = math.rsqrt %33 : vector<64x1xf32>
    %35 = vector.broadcast %34 : vector<64x1xf32> to vector<64x32xf32>
    %36 = arith.mulf %31, %35 : vector<64x32xf32>
    %c0_18 = arith.constant 0 : index
    %c0_19 = arith.constant 0 : index
    %37 = vector.load %arg9[%c0_18, %c0_19] : memref<1x32xf32, #tpu.memory_space<vmem>>, vector<1x32xf32>
    %38 = vector.broadcast %37 : vector<1x32xf32> to vector<64x32xf32>
    %39 = arith.mulf %36, %38 : vector<64x32xf32>
    %c0_20 = arith.constant 0 : index
    %c0_21 = arith.constant 0 : index
    %40 = vector.load %arg10[%c0_20, %c0_21] : memref<1x32xf32, #tpu.memory_space<vmem>>, vector<1x32xf32>
    %41 = vector.broadcast %40 : vector<1x32xf32> to vector<64x32xf32>
    %42 = arith.addf %39, %41 : vector<64x32xf32>
    %cst_22 = arith.constant 0.000000e+00 : f32
    %43 = vector.broadcast %cst_22 : f32 to vector<64x32xf32>
    %44 = arith.maximumf %42, %43 : vector<64x32xf32>
    %c0_23 = arith.constant 0 : index
    %c0_24 = arith.constant 0 : index
    %45 = vector.load %arg2[%c0_23, %c0_24] : memref<32x64xbf16, #tpu.memory_space<vmem>>, vector<32x64xbf16>
    %c0_25 = arith.constant 0 : index
    %c0_26 = arith.constant 0 : index
    %46 = vector.load %arg5[%c0_25, %c0_26] : memref<32x1xf32, #tpu.memory_space<vmem>>, vector<32x1xf32>
    %c0_27 = arith.constant 0 : index
    %c0_28 = arith.constant 0 : index
    %47 = vector.load %arg19[%c0_27, %c0_28] : memref<64x32xf32, #tpu.memory_space<vmem>>, vector<64x32xf32>
    tpu.vector_store %arg19[%c0_27, %c0_28], %44 {strides = array<i32>} : memref<64x32xf32, #tpu.memory_space<vmem>>, vector<64x32xf32>,
    %48 = arith.index_cast %1 : i32 to index
    %c0_29 = arith.constant 0 : index
    %49 = vector.load %arg19[%48, %c0_29] : memref<64x32xf32, #tpu.memory_space<vmem>>, vector<32x32xf32>
    %50 = arith.truncf %44 : vector<64x32xf32> to vector<64x32xbf16>
    %cst_30 = arith.constant dense<0.000000e+00> : vector<32x32xf32>
    %51 = tpu.matmul %45, %50, %cst_30 {dimension_numbers = #tpu.dot_dimension_numbers<[1], [0], [0], [1], [0, 0, 1, 1], [], []>} : vector<32x64xbf16>, vector<64x32xbf16>, vector<32x32xf32> -> vector<32x32xf32>
    %52 = vector.broadcast %46 : vector<32x1xf32> to vector<32x32xf32>
    %53 = arith.mulf %51, %52 : vector<32x32xf32>
    %54 = arith.truncf %49 : vector<32x32xf32> to vector<32x32xbf16>
    %55 = arith.truncf %53 : vector<32x32xf32> to vector<32x32xbf16>
    %c0_31 = arith.constant 0 : index
    %c0_32 = arith.constant 0 : index
    %56 = vector.load %arg11[%c0_31, %c0_32] : memref<32x32xbf16, #tpu.memory_space<vmem>>, vector<32x32xbf16>
    %cst_33 = arith.constant dense<0.000000e+00> : vector<32x32xf32>
    %57 = tpu.matmul %55, %56, %cst_33 {dimension_numbers = #tpu.dot_dimension_numbers<[1], [0], [0], [1], [0, 0, 1, 1], [], []>} : vector<32x32xbf16>, vector<32x32xbf16>, vector<32x32xf32> -> vector<32x32xf32>
    %c0_34 = arith.constant 0 : index
    %c0_35 = arith.constant 0 : index
    %58 = vector.load %arg12[%c0_34, %c0_35] : memref<32x32xbf16, #tpu.memory_space<vmem>>, vector<32x32xbf16>
    %cst_36 = arith.constant dense<0.000000e+00> : vector<32x32xf32>
    %59 = tpu.matmul %54, %58, %cst_36 {dimension_numbers = #tpu.dot_dimension_numbers<[1], [0], [0], [1], [0, 0, 1, 1], [], []>} : vector<32x32xbf16>, vector<32x32xbf16>, vector<32x32xf32> -> vector<32x32xf32>
    %60 = arith.addf %57, %59 : vector<32x32xf32>
    %c0_37 = arith.constant 0 : index
    %c0_38 = arith.constant 0 : index
    %61 = vector.load %arg13[%c0_37, %c0_38] : memref<1x32xf32, #tpu.memory_space<vmem>>, vector<1x32xf32>
    %62 = vector.broadcast %61 : vector<1x32xf32> to vector<32x32xf32>
    %63 = arith.addf %60, %62 : vector<32x32xf32>
    %cst_39 = arith.constant dense<0.000000e+00> : vector<32xf32>
    %64 = vector.multi_reduction <add>, %63, %cst_39 [1] : vector<32x32xf32> to vector<32xf32>
    %65 = vector.shape_cast %64 : vector<32xf32> to vector<32x1xf32>
    %cst_40 = arith.constant 3.200000e+01 : f32
    %66 = vector.broadcast %cst_40 : f32 to vector<32x1xf32>
    %67 = arith.divf %65, %66 : vector<32x1xf32>
    %68 = vector.broadcast %67 : vector<32x1xf32> to vector<32x32xf32>
    %69 = arith.subf %63, %68 : vector<32x32xf32>
    %70 = arith.mulf %69, %69 : vector<32x32xf32>
    %cst_41 = arith.constant dense<0.000000e+00> : vector<32xf32>
    %71 = vector.multi_reduction <add>, %70, %cst_41 [1] : vector<32x32xf32> to vector<32xf32>
    %72 = vector.shape_cast %71 : vector<32xf32> to vector<32x1xf32>
    %cst_42 = arith.constant 3.200000e+01 : f32
    %73 = vector.broadcast %cst_42 : f32 to vector<32x1xf32>
    %74 = arith.divf %72, %73 : vector<32x1xf32>
    %75 = vector.broadcast %67 : vector<32x1xf32> to vector<32x32xf32>
    %76 = arith.subf %63, %75 : vector<32x32xf32>
    %cst_43 = arith.constant 9.99999974E-6 : f32
    %77 = vector.broadcast %cst_43 : f32 to vector<32x1xf32>
    %78 = arith.addf %74, %77 : vector<32x1xf32>
    %79 = math.rsqrt %78 : vector<32x1xf32>
    %80 = vector.broadcast %79 : vector<32x1xf32> to vector<32x32xf32>
    %81 = arith.mulf %76, %80 : vector<32x32xf32>
    %c0_44 = arith.constant 0 : index
    %c0_45 = arith.constant 0 : index
    %82 = vector.load %arg14[%c0_44, %c0_45] : memref<1x32xf32, #tpu.memory_space<vmem>>, vector<1x32xf32>
    %83 = vector.broadcast %82 : vector<1x32xf32> to vector<32x32xf32>
    %84 = arith.mulf %81, %83 : vector<32x32xf32>
    %c0_46 = arith.constant 0 : index
    %c0_47 = arith.constant 0 : index
    %85 = vector.load %arg15[%c0_46, %c0_47] : memref<1x32xf32, #tpu.memory_space<vmem>>, vector<1x32xf32>
    %86 = vector.broadcast %85 : vector<1x32xf32> to vector<32x32xf32>
    %87 = arith.addf %84, %86 : vector<32x32xf32>
    %cst_48 = arith.constant 0.000000e+00 : f32
    %88 = vector.broadcast %cst_48 : f32 to vector<32x32xf32>
    %89 = arith.maximumf %87, %88 : vector<32x32xf32>
    %90 = arith.truncf %89 : vector<32x32xf32> to vector<32x32xbf16>
    %c0_49 = arith.constant 0 : index
    %c0_50 = arith.constant 0 : index
    %91 = vector.load %arg16[%c0_49, %c0_50] : memref<32x8xbf16, #tpu.memory_space<vmem>>, vector<32x8xbf16>
    %cst_51 = arith.constant dense<0.000000e+00> : vector<32x8xf32>
    %92 = tpu.matmul %90, %91, %cst_51 {dimension_numbers = #tpu.dot_dimension_numbers<[1], [0], [0], [1], [0, 0, 1, 1], [], []>} : vector<32x32xbf16>, vector<32x8xbf16>, vector<32x8xf32> -> vector<32x8xf32>
    %c0_52 = arith.constant 0 : index
    %c0_53 = arith.constant 0 : index
    %93 = vector.load %arg17[%c0_52, %c0_53] : memref<1x8xf32, #tpu.memory_space<vmem>>, vector<1x8xf32>
    %94 = vector.broadcast %93 : vector<1x8xf32> to vector<32x8xf32>
    %95 = arith.addf %92, %94 : vector<32x8xf32>
    %cst_54 = arith.constant dense<0xFF800000> : vector<32xf32>
    %96 = vector.multi_reduction <maximumf>, %95, %cst_54 [1] : vector<32x8xf32> to vector<32xf32>
    %97 = vector.shape_cast %96 : vector<32xf32> to vector<32x1xf32>
    %98 = vector.broadcast %97 : vector<32x1xf32> to vector<32x8xf32>
    %99 = arith.subf %95, %98 : vector<32x8xf32>
    %100 = math.exp %99 : vector<32x8xf32>
    %cst_55 = arith.constant dense<0.000000e+00> : vector<32xf32>
    %101 = vector.multi_reduction <add>, %100, %cst_55 [1] : vector<32x8xf32> to vector<32xf32>
    %102 = vector.shape_cast %101 : vector<32xf32> to vector<32x1xf32>
    %103 = math.log %102 : vector<32x1xf32>
    %104 = vector.broadcast %103 : vector<32x1xf32> to vector<32x8xf32>
    %105 = arith.subf %99, %104 : vector<32x8xf32>
    %c0_56 = arith.constant 0 : index
    %c0_57 = arith.constant 0 : index
    %106 = vector.load %arg18[%c0_56, %c0_57] : memref<32x8xf32, #tpu.memory_space<vmem>>, vector<32x8xf32>
    tpu.vector_store %arg18[%c0_56, %c0_57], %105 {strides = array<i32>} : memref<32x8xf32, #tpu.memory_space<vmem>>, vector<32x8xf32>,
    return
  }
  func.func @transform_0(%arg0: i32) -> (i32, i32) {
    %c0_i32 = arith.constant 0 : i32
    %c0_i32_0 = arith.constant 0 : i32
    %c0_i32_1 = arith.constant 0 : i32
    return %c0_i32, %c0_i32_0 : i32, i32
  }
  func.func @transform_1(%arg0: i32) -> (i32, i32) {
    %c0_i32 = arith.constant 0 : i32
    %c0_i32_0 = arith.constant 0 : i32
    return %arg0, %c0_i32 : i32, i32
  }
  func.func @transform_2(%arg0: i32) -> (i32, i32) {
    %c0_i32 = arith.constant 0 : i32
    %c0_i32_0 = arith.constant 0 : i32
    %c0_i32_1 = arith.constant 0 : i32
    return %c0_i32, %c0_i32_0 : i32, i32
  }
  func.func @transform_3(%arg0: i32) -> (i32, i32) {
    %c0_i32 = arith.constant 0 : i32
    %c0_i32_0 = arith.constant 0 : i32
    %c0_i32_1 = arith.constant 0 : i32
    return %c0_i32, %c0_i32_0 : i32, i32
  }
  func.func @transform_4(%arg0: i32) -> (i32, i32) {
    %c0_i32 = arith.constant 0 : i32
    %c0_i32_0 = arith.constant 0 : i32
    return %arg0, %c0_i32 : i32, i32
  }
  func.func @transform_5(%arg0: i32) -> (i32, i32) {
    %c0_i32 = arith.constant 0 : i32
    %c0_i32_0 = arith.constant 0 : i32
    %c0_i32_1 = arith.constant 0 : i32
    return %c0_i32, %c0_i32_0 : i32, i32
  }
  func.func @transform_6(%arg0: i32) -> (i32, i32) {
    %c0_i32 = arith.constant 0 : i32
    %c0_i32_0 = arith.constant 0 : i32
    %c0_i32_1 = arith.constant 0 : i32
    return %c0_i32, %c0_i32_0 : i32, i32
  }
  func.func @transform_7(%arg0: i32) -> (i32, i32) {
    %c0_i32 = arith.constant 0 : i32
    %c0_i32_0 = arith.constant 0 : i32
    %c0_i32_1 = arith.constant 0 : i32
    return %c0_i32, %c0_i32_0 : i32, i32
  }
  func.func @transform_8(%arg0: i32) -> (i32, i32) {
    %c0_i32 = arith.constant 0 : i32
    %c0_i32_0 = arith.constant 0 : i32
    %c0_i32_1 = arith.constant 0 : i32
    return %c0_i32, %c0_i32_0 : i32, i32
  }
  func.func @transform_9(%arg0: i32) -> (i32, i32) {
    %c0_i32 = arith.constant 0 : i32
    %c0_i32_0 = arith.constant 0 : i32
    %c0_i32_1 = arith.constant 0 : i32
    return %c0_i32, %c0_i32_0 : i32, i32
  }
  func.func @transform_10(%arg0: i32) -> (i32, i32) {
    %c0_i32 = arith.constant 0 : i32
    %c0_i32_0 = arith.constant 0 : i32
    %c0_i32_1 = arith.constant 0 : i32
    return %c0_i32, %c0_i32_0 : i32, i32
  }
  func.func @transform_11(%arg0: i32) -> (i32, i32) {
    %c0_i32 = arith.constant 0 : i32
    %c0_i32_0 = arith.constant 0 : i32
    %c0_i32_1 = arith.constant 0 : i32
    return %c0_i32, %c0_i32_0 : i32, i32
  }
  func.func @transform_12(%arg0: i32) -> (i32, i32) {
    %c0_i32 = arith.constant 0 : i32
    %c0_i32_0 = arith.constant 0 : i32
    %c0_i32_1 = arith.constant 0 : i32
    return %c0_i32, %c0_i32_0 : i32, i32
  }
  func.func @transform_13(%arg0: i32) -> (i32, i32) {
    %c0_i32 = arith.constant 0 : i32
    %c0_i32_0 = arith.constant 0 : i32
    %c0_i32_1 = arith.constant 0 : i32
    return %c0_i32, %c0_i32_0 : i32, i32
  }
  func.func @transform_14(%arg0: i32) -> (i32, i32) {
    %c0_i32 = arith.constant 0 : i32
    %c0_i32_0 = arith.constant 0 : i32
    %c0_i32_1 = arith.constant 0 : i32
    return %c0_i32, %c0_i32_0 : i32, i32
  }
  func.func @transform_15(%arg0: i32) -> (i32, i32) {
    %c0_i32 = arith.constant 0 : i32
    %c0_i32_0 = arith.constant 0 : i32
    %c0_i32_1 = arith.constant 0 : i32
    return %c0_i32, %c0_i32_0 : i32, i32
  }
  func.func @transform_16(%arg0: i32) -> (i32, i32) {
    %c0_i32 = arith.constant 0 : i32
    %c0_i32_0 = arith.constant 0 : i32
    %c0_i32_1 = arith.constant 0 : i32
    return %c0_i32, %c0_i32_0 : i32, i32
  }
  func.func @transform_17(%arg0: i32) -> (i32, i32) {
    %c0_i32 = arith.constant 0 : i32
    %c0_i32_0 = arith.constant 0 : i32
    return %arg0, %c0_i32 : i32, i32
  }
}

</mosaic_0001>

<bundles_post_ra>
// kernel: sage_model_forward.1
= control target key start
LH: loop header
LB: loop body
LE: loop exit
PB: predicated region body
PF: predicated region fallthrough
CT: control target
= control target key end

     0   :  { %s1975_s24 = smov 0   ;;  %s2224_s0 = inlined_call_operand.vmem [shape: bf16[64,64], index: 0, kind: input, shape index: {}, may-alias: {0,1}]   ;;  %s2225_s1 = inlined_call_operand.vmem [shape: bf16[64,64], index: 1, kind: input, shape index: {}, may-alias: {0,1}]   ;;  %s2226_s2 = inlined_call_operand.vmem [shape: f32[64,16], index: 2, kind: input, shape index: {}]   ;;  %s2227_s3 = inlined_call_operand.vmem [shape: f32[64,1], index: 3, kind: input, shape index: {}, may-alias: {3,4}]   ;;  %s2228_s4 = inlined_call_operand.vmem [shape: f32[64,1], index: 4, kind: input, shape index: {}, may-alias: {3,4}]   ;;  %s2229_s5 = inlined_call_operand.vmem [shape: bf16[16,32], index: 5, kind: input, shape index: {}]   ;;  %s2230_s6 = inlined_call_operand.vmem [shape: bf16[16,32], index: 6, kind: input, shape index: {}]   ;;  %s2231_s7 = inlined_call_operand.vmem [shape: f32[1,32], index: 7, kind: input, shape index: {}]   ;;  %s2232_s8 = inlined_call_operand.vmem [shape: f32[1,32], index: 8, kind: input, shape index: {}]   ;;  %s2233_s9 = inlined_call_operand.vmem [shape: f32[1,32], index: 9, kind: input, shape index: {}]   ;;  %s2234_s10 = inlined_call_operand.vmem [shape: bf16[32,32], index: 10, kind: input, shape index: {}]   ;;  %s2235_s11 = inlined_call_operand.vmem [shape: bf16[32,32], index: 11, kind: input, shape index: {}]   ;;  %s2236_s12 = inlined_call_operand.vmem [shape: f32[1,32], index: 12, kind: input, shape index: {}]   ;;  %s2237_s13 = inlined_call_operand.vmem [shape: f32[1,32], index: 13, kind: input, shape index: {}]   ;;  %s2238_s14 = inlined_call_operand.vmem [shape: f32[1,32], index: 14, kind: input, shape index: {}]   ;;  %s2239_s15 = inlined_call_operand.vmem [shape: bf16[32,8], index: 15, kind: input, shape index: {}]   ;;  %s2240_s16 = inlined_call_operand.vmem [shape: f32[1,8], index: 16, kind: input, shape index: {}]   ;;  %s2241_s17 = inlined_call_operand.vmem [shape: f32[64,8], index: 17, kind: output, shape index: {}]  }
   0x1   :  { %2243 = sst [smem:[#allocation3_spill]] %s2224_s0 }
   0x2   :  { %2244 = sst [smem:[#allocation4_spill]] %s2225_s1 }
   0x3 LB: > { %s1636_s25 = sadd.s32 4294967295, %s1882_s24   ;;  %p1640_p0 = scmp.ge.s32.totalorder %s1882_s24, 1  ;;  %s1882_s24 = sphi %s1975_s24, %s27_s24  }
   0x4   : > { %p499_p1 = scmp.lt.s32.totalorder %s1882_s24, 3 }
   0x6   : > { %p500_p2 = pnand %p1640_p0, %p499_p1 }
   0x7   : > { %v576_v0 = vld [vmem:[%s2226_s2] sm:$0xff] (!%p500_p2)  ;;  %v577_v1 = vld [vmem:[%s2226_s2 + $0x8] sm:$0xff] (!%p500_p2)  ;;  %v578_v2 = vld [vmem:[%s2226_s2 + $0x10] sm:$0xff] (!%p500_p2)  ;;  %v1884_v5 = vmov (!%p500_p2), 0   ;;  %vm624_vm0 = vcmask (!%p500_p2), 523264   ;;  %s2245_s27 = sld [smem:[#allocation3_spill]] (!%p500_p2) }
   0x8   : > { %503 = sbr.rel (%p500_p2) target bundleno = 2097 (0x831), region = 88  ;;  %v600_v3 = vpack.c.bf16 (!%p500_p2), %v577_v1, %v576_v0  ;;  %v579_v4 = vld [vmem:[%s2226_s2 + $0x18] sm:$0xff] (!%p500_p2)  ;;  %1820 = vset.pattern.permute.xlu0 (!%p500_p2), %v1884_v5  ;;  %1821 = vset.pattern.permute.xlu1 (!%p500_p2), %v1884_v5  ;;  %v580_v7 = vld [vmem:[%s2226_s2 + $0x20] sm:$0xff] (!%p500_p2)  ;;  %v581_v8 = vld [vmem:[%s2226_s2 + $0x28] sm:$0xff] (!%p500_p2)  ;;  %vm764_vm1 = vcmask (!%p500_p2), 130048   ;;  %vm940_vm2 = vcmask (!%p500_p2), 261120  }
   0x9   : > { %v601_v6 = vpack.c.bf16 (!%p500_p2), %v579_v4, %v578_v2  ;;  %v602_v10 = vpack.c.bf16 (!%p500_p2), %v581_v8, %v580_v7  ;;  %v582_v11 = vld [vmem:[%s2226_s2 + $0x30] sm:$0xff] (!%p500_p2)  ;;  %v583_v12 = vld [vmem:[%s2226_s2 + $0x38] sm:$0xff] (!%p500_p2)  ;;  %v592_v13 = vld [vmem:[%s2227_s3] sm:$0xff] (!%p500_p2)  ;;  %s1641_s21 = sshll.u32 (!%p500_p2), %s1636_s25, 2  ;;  %s2246_s28 = sld [smem:[#allocation4_spill]] (!%p500_p2)  ;;  %vm1513_vm3 = vcmask (!%p500_p2), 64512  }
   0xa   : > { %1727 = vmatprep.subr.bf16.mxu0 (!%p500_p2), %v600_v3  ;;  %704 = vperm.xlu0 (!%p500_p2), %1820, %v592_v13   ;;  %v594_v14 = vld [vmem:[%s2227_s3 + $0x10] sm:$0xff] (!%p500_p2)  ;;  %v593_v15 = vld [vmem:[%s2227_s3 + $0x8] sm:$0xff] (!%p500_p2)  ;;  %v603_v16 = vpack.c.bf16 (!%p500_p2), %v583_v12, %v582_v11  ;;  %v595_v17 = vld [vmem:[%s2227_s3 + $0x18] sm:$0xff] (!%p500_p2)  ;;  %p557_p3 = scmp.lt.s32.totalorder (!%p500_p2), %s1641_s21, 7  ;;  %s1647_s20 = sshll.u32 (!%p500_p2), %s1636_s25, 5 }
   0xb   : > { %1728 = vmatpush3.bf16.msra.mxu0 (!%p500_p2), %v600_v3  ;;  %714 = vperm.xlu1 (!%p500_p2), %1821, %v594_v14   ;;  %v596_v18 = vld [vmem:[%s2227_s3 + $0x20] sm:$0xff] (!%p500_p2)  ;;  %v597_v20 = vld [vmem:[%s2227_s3 + $0x28] sm:$0xff] (!%p500_p2)  ;;  %v598_v24 = vld [vmem:[%s2227_s3 + $0x30] sm:$0xff] (!%p500_p2) }
   0xc   : > { %1729 = vmatprep.subr.bf16.mxu0 (!%p500_p2), %v601_v6  ;;  %v1826_v19 = vld [vmem:[%s2230_s6] sm:$0xff] (!%p500_p2)   ;;  %1745 = vmatprep.mubr.msk.bf16.mxu1 (!%p500_p2), %vm764_vm1, %v600_v3  ;;  %v599_v25 = vld [vmem:[%s2227_s3 + $0x38] sm:$0xff] (!%p500_p2) }
   0xd   : > { %v1822_v9 = vld [vmem:[%s2245_s27] sm:$0xff] (!%p500_p2)   ;;  %1743 = vmatprep.subr.bf16.mxu1 (!%p500_p2), %v1826_v19  ;;  %v1823_v22 = vld [vmem:[%s2245_s27 + $0x8] sm:$0xff] (!%p500_p2)   ;;  %v1824_v23 = vld [vmem:[%s2245_s27 + $0x10] sm:$0xff] (!%p500_p2)  }
   0xe   : > { %1735 = vmatprep.mubr.msk.bf16.mxu0 (!%p500_p2), %vm624_vm0, %v1822_v9  ;;  %709 = vperm.xlu0 (!%p500_p2), %1820, %v593_v15   ;;  %v1827_v21 = vld [vmem:[%s2229_s5] sm:$0xff] (!%p500_p2)   ;;  %v1825_v26 = vld [vmem:[%s2245_s27 + $0x18] sm:$0xff] (!%p500_p2)  }
   0xf   : > { %1730 = vmatpush3.bf16.msra.mxu0 %v601_v6  ;;  %719 = vperm.xlu1 %1821, %v595_v17   ;;  %v1666_v55 = vld [vmem:[%s2231_s7] ss:$0 sm:$0xff]  ;;  %s2248_s21 = smov (!%p557_p3, %s1641_s21), 7 }
  0x10   : > { %1731 = vmatprep.subr.bf16.mxu0 %v602_v10  ;;  %1744 = vmatpush3.bf16.msra.mxu1 %v1826_v19  ;;  %s1642_s22 = sshll.u32 %s2248_s21, 2  ;;  %s1644_s0 = sshll.u32 %s2248_s21, 3 }
  0x11   : > { %1753 = vmatprep.subr.bf16.mxu1 %v1827_v21  ;;  %s2080_s29 = scalar_lea.vmem %s2246_s28, %s1642_s22  ;;  %s566_s19 = scalar_lea.vmem %s2228_s4, %s1644_s0 }
  0x12   : > { %724 = vperm.xlu0 %1820, %v596_v18   ;;  %s1100_s22 = scalar_lea.vmem [#allocation2], %s1647_s20  ;;  %s572_s30 = scalar_lea.vmem %s2241_s17, %s1644_s0 }
  0x13   : > { %1732 = vmatpush3.bf16.msra.mxu0 %v602_v10  ;;  %729 = vperm.xlu1 %1821, %v597_v20  }
  0x14   : > { %1733 = vmatprep.subr.bf16.mxu0 %v603_v16  ;;  %1746 = vmatmul.mubr.msk.bf16.vlgmr.msra.gmra.mrb[0].mxu1 %vm764_vm1, %v601_v6 }
  0x15   : > { %1754 = vmatpush3.bf16.msra.mxu1 %v1827_v21  ;;  %1749 = vmatprep.mubr.msk.bf16.mxu1 %vm764_vm1, %v602_v10 }
  0x16   : > { %734 = vperm.xlu0 %1820, %v598_v24  }
  0x17   : > { %1734 = vmatpush3.bf16.msra.mxu0 %v603_v16  ;;  %739 = vperm.xlu1 %1821, %v599_v25  }
  0x1a   : > { %1736 = vmatmul.mubr.msk.bf16.vlgmr.msra.gmra.mrb[0].mxu0 %vm624_vm0, %v1823_v22 }
  0x1b   : > { %1739 = vmatprep.mubr.msk.bf16.mxu0 %vm624_vm0, %v1824_v23 }
  0x1c   : > { %1750 = vmatmul.mubr.msk.bf16.gmra.mrb[4].mxu1 %vm764_vm1, %v603_v16 }
  0x22   : > { %1740 = vmatmul.mubr.msk.bf16.gmra.mrb[4].mxu0 %vm624_vm0, %v1825_v26 }
  0x89   : > { %v705_v27 = vpop.permute.xlu0 %704 }
  0x8a   : > { %v715_v28 = vpop.permute.xlu1 %714 }
  0x8d   : > { %v710_v29 = vpop.permute.xlu0 %709 }
  0x8e   : > { %v720_v30 = vpop.permute.xlu1 %719 }
  0x91   : > { %v725_v34 = vpop.permute.xlu0 %724 }
  0x92   : > { %v730_v38 = vpop.permute.xlu1 %729 }
  0x95   : > { %v735_v44 = vpop.permute.xlu0 %734 }
  0x96   : > { %v740_v46 = vpop.permute.xlu1 %739 }
  0xed   : > { %v1737_v31 = vpop.f32.mrb[0].mxu0 }
  0xee   : > { %v671_v32 = vpop.f32.mrb[1].mxu0  ;;  %v744_v35 = vmul.f32 %v1737_v31, %v715_v28 }
  0xef   : > { %v1738_v33 = vpop.f32.mrb[2].mxu0  ;;  %v742_v39 = vmul.f32 %v705_v27, %v671_v32 }
  0xf0   : > { %v745_v36 = vmul.f32 %v1738_v33, %v720_v30  ;;  %v674_v37 = vpop.f32.mrb[3].mxu0 }
  0xf1   : > { %v743_v40 = vmul.f32 %v710_v29, %v674_v37 }
  0xf2   : > { %v751_v41 = vpack.c.bf16 %v745_v36, %v744_v35 }
  0xf3   : > { %v750_v42 = vpack.c.bf16 %v743_v40, %v742_v39 }
  0xf5   : > { %v1741_v43 = vpop.f32.mrb[4].mxu0  ;;  %1755 = vmatprep.mubr.msk.bf16.mxu1 %vm764_vm1, %v750_v42 }
  0xf6   : > { %v687_v45 = vpop.f32.mrb[5].mxu0  ;;  %1756 = vmatmul.mubr.msk.bf16.vlgmr.msra.gmra.mrb[0].mxu1 %vm764_vm1, %v751_v41  ;;  %v748_v48 = vmul.f32 %v1741_v43, %v735_v44 }
  0xf7   : > { %v1742_v47 = vpop.f32.mrb[6].mxu0  ;;  %v746_v51 = vmul.f32 %v725_v34, %v687_v45 }
  0xf8   : > { %v749_v49 = vmul.f32 %v1742_v47, %v740_v46  ;;  %v690_v50 = vpop.f32.mrb[7].mxu0 }
  0xf9   : > { %v747_v52 = vmul.f32 %v730_v38, %v690_v50 }
  0xfa   : > { %v753_v53 = vpack.c.bf16 %v749_v49, %v748_v48 }
  0xfb   : > { %v752_v54 = vpack.c.bf16 %v747_v52, %v746_v51 }
  0xfd   : > { %1759 = vmatprep.mubr.msk.bf16.mxu1 %vm764_vm1, %v752_v54 }
  0xfe   : > { %1760 = vmatmul.mubr.msk.bf16.gmra.mrb[4].mxu1 %vm764_vm1, %v753_v53 }
 0x1c9   : > { %v1757_v56 = vpop.f32.mrb[0].mxu1 }
 0x1ca   : > { %v894_v57 = vpop.f32.mrb[1].mxu1  ;;  %v934_v61 = vadd.f32 %v1757_v56, %v1666_v55  ;;  %v1088_v56 = vld [vmem:[%s566_s19] sm:$0xff] }
 0x1cb   : > { %v932_v58 = vadd.f32 %v1666_v55, %v894_v57  ;;  %v1758_v59 = vpop.f32.mrb[2].mxu1  ;;  %v1090_v57 = vld [vmem:[%s566_s19 + $0x10] sm:$0xff] }
 0x1cc   : > { %v897_v60 = vpop.f32.mrb[3].mxu1  ;;  %v935_v1 = vadd.f32 %v1758_v59, %v1666_v55  ;;  %v947_v3 = vsel %vm940_vm2, %v934_v61, 0.0  ;;  %v1089_v59 = vld [vmem:[%s566_s19 + $0x8] sm:$0xff] }
 0x1cd   : > { %v933_v62 = vadd.f32 %v1666_v55, %v897_v60  ;;  %v941_v63 = vsel %vm940_vm2, %v932_v58, 0.0  ;;  %v1829_v60 = vld [vmem:[%s2235_s11] sm:$0xff]  }
 0x1ce   : > { %942 = vadd.xlane.f32.xlu0 %v941_v63  ;;  %v950_v10 = vsel %vm940_vm2, %v935_v1, 0.0  ;;  %1775 = vmatprep.subr.bf16.mxu1 %v1829_v60  ;;  %v2139_v63 = vld [vmem:[%s2234_s10] sm:$0xff]  }
 0x1cf   : > { %v944_v0 = vsel %vm940_vm2, %v933_v62, 0.0  ;;  %1776 = vmatpush3.bf16.msra.mxu1 %v1829_v60 }
 0x1d0   : > { %945 = vadd.xlane.f32.xlu1 %v944_v0 }
 0x1d1   : > { %v1761_v2 = vpop.f32.mrb[4].mxu1 }
 0x1d2   : > { %948 = vadd.xlane.f32.xlu0 %v947_v3  ;;  %v910_v4 = vpop.f32.mrb[5].mxu1  ;;  %v938_v8 = vadd.f32 %v1761_v2, %v1666_v55 }
 0x1d3   : > { %v936_v5 = vadd.f32 %v1666_v55, %v910_v4  ;;  %v1762_v6 = vpop.f32.mrb[6].mxu1 }
 0x1d4   : > { %v913_v7 = vpop.f32.mrb[7].mxu1  ;;  %v939_v12 = vadd.f32 %v1762_v6, %v1666_v55  ;;  %v959_v13 = vsel %vm940_vm2, %v938_v8, 0.0 }
 0x1d5   : > { %v937_v9 = vadd.f32 %v1666_v55, %v913_v7  ;;  %v953_v11 = vsel %vm940_vm2, %v936_v5, 0.0 }
 0x1d6   : > { %951 = vadd.xlane.f32.xlu0 %v950_v10  ;;  %954 = vadd.xlane.f32.xlu1 %v953_v11  ;;  %v962_v15 = vsel %vm940_vm2, %v939_v12, 0.0 }
 0x1d7   : > { %v956_v14 = vsel %vm940_vm2, %v937_v9, 0.0 }
 0x1da   : > { %960 = vadd.xlane.f32.xlu1 %v959_v13  ;;  %957 = vadd.xlane.f32.xlu0 %v956_v14 }
 0x1de   : > { %963 = vadd.xlane.f32.xlu0 %v962_v15 }
 0x25b   : > { %v943_v16 = vpop.xlane.xlu0 %942 }
 0x25c   : > { %v966_v17 = vmul.f32 0.03125, %v943_v16 }
 0x25d   : > { %v946_v18 = vpop.xlane.xlu1 %945 }
 0x25e   : > { %v2082_v19 = vsub.f32 %v932_v58, %v966_v17  ;;  %v967_v20 = vmul.f32 0.03125, %v946_v18  ;;  %v1091_v58 = vld [vmem:[%s566_s19 + $0x18] sm:$0xff] }
 0x25f   : > { %v949_v21 = vpop.xlane.xlu0 %948 }
 0x260   : > { %v2084_v22 = vsub.f32 %v933_v62, %v967_v20  ;;  %v968_v23 = vmul.f32 0.03125, %v949_v21  ;;  %v982_v24 = vmul.f32 %v2082_v19, %v2082_v19  ;;  %v1831_v62 = vld [vmem:[%s2235_s11 + $0x8] sm:$0xff]  }
 0x261   : > { %1777 = vmatprep.subr.bf16.mxu1 %v1831_v62 }
 0x262   : > { %v2088_v25 = vsub.f32 %v934_v61, %v968_v23  ;;  %v990_v26 = vsel %vm940_vm2, %v982_v24, 0.0  ;;  %v983_v27 = vmul.f32 %v2084_v22, %v2084_v22  ;;  %v1830_v61 = vld [vmem:[%s2080_s29] sm:$0xff]   ;;  %1778 = vmatpush3.bf16.msra.mxu1 %v1831_v62 }
 0x263   : > { %v952_v28 = vpop.xlane.xlu0 %951  ;;  %991 = vadd.xlane.f32.xlu1 %v990_v26  ;;  %v955_v29 = vpop.xlane.xlu1 %954  ;;  %1771 = vmatprep.mubr.msk.bf16.mxu0 %vm624_vm0, %v1830_v61  ;;  %v1667_v24 = vld [vmem:[%s2232_s8] ss:$0 sm:$0xff] }
 0x264   : > { %v969_v30 = vmul.f32 0.03125, %v952_v28  ;;  %v970_v31 = vmul.f32 0.03125, %v955_v29  ;;  %v993_v32 = vsel %vm940_vm2, %v983_v27, 0.0  ;;  %v984_v33 = vmul.f32 %v2088_v25, %v2088_v25  ;;  %1783 = vmatprep.subr.bf16.mxu1 %v2139_v63 }
 0x265   : > { %994 = vadd.xlane.f32.xlu0 %v993_v32 }
 0x266   : > { %v2096_v34 = vsub.f32 %v935_v1, %v969_v30  ;;  %v2098_v35 = vsub.f32 %v936_v5, %v970_v31  ;;  %v996_v36 = vsel %vm940_vm2, %v984_v33, 0.0  ;;  %v1668_v30 = vld [vmem:[%s2233_s9] ss:$0 sm:$0xff] }
 0x267   : > { %997 = vadd.xlane.f32.xlu1 %v996_v36  ;;  %v961_v37 = vpop.xlane.xlu1 %960  ;;  %v958_v38 = vpop.xlane.xlu0 %957 }
 0x268   : > { %v972_v39 = vmul.f32 0.03125, %v961_v37  ;;  %v971_v40 = vmul.f32 0.03125, %v958_v38  ;;  %v986_v41 = vmul.f32 %v2098_v35, %v2098_v35  ;;  %v985_v42 = vmul.f32 %v2096_v34, %v2096_v34 }
 0x26a   : > { %v2105_v43 = vsub.f32 %v938_v8, %v972_v39  ;;  %v2107_v44 = vsub.f32 %v937_v9, %v971_v40  ;;  %v1002_v45 = vsel %vm940_vm2, %v986_v41, 0.0  ;;  %v999_v46 = vsel %vm940_vm2, %v985_v42, 0.0 }
 0x26b   : > { %1003 = vadd.xlane.f32.xlu1 %v1002_v45  ;;  %1000 = vadd.xlane.f32.xlu0 %v999_v46  ;;  %v964_v47 = vpop.xlane.xlu0 %963 }
 0x26c   : > { %v973_v48 = vmul.f32 0.03125, %v964_v47  ;;  %v988_v49 = vmul.f32 %v2105_v43, %v2105_v43  ;;  %v987_v50 = vmul.f32 %v2107_v44, %v2107_v44 }
 0x26e   : > { %v2115_v51 = vsub.f32 %v939_v12, %v973_v48  ;;  %v1008_v52 = vsel %vm940_vm2, %v988_v49, 0.0  ;;  %v1005_v53 = vsel %vm940_vm2, %v987_v50, 0.0 }
 0x26f   : > { %1009 = vadd.xlane.f32.xlu1 %v1008_v52  ;;  %1006 = vadd.xlane.f32.xlu0 %v1005_v53 }
 0x270   : > { %v989_v54 = vmul.f32 %v2115_v51, %v2115_v51 }
 0x272   : > { %v1011_v55 = vsel %vm940_vm2, %v989_v54, 0.0 }
 0x273   : > { %1012 = vadd.xlane.f32.xlu0 %v1011_v55 }
 0x280   : > { %1176 = vperm.xlu1 %1821, %v1088_v56  }
 0x284   : > { %1186 = vperm.xlu1 %1821, %v1090_v57  }
 0x288   : > { %1191 = vperm.xlu1 %1821, %v1091_v58  }
 0x289   : > { %1181 = vperm.xlu0 %1820, %v1089_v59  }
 0x2f0   : > { %v992_v0 = vpop.xlane.xlu1 %991 }
 0x2f1   : > { %v1014_v1 = vmul.f32 0.03125, %v992_v0 }
 0x2f2   : > { %v995_v2 = vpop.xlane.xlu0 %994 }
 0x2f3   : > { %v1022_v3 = vadd.f32 1e-05, %v1014_v1  ;;  %v1015_v4 = vmul.f32 0.03125, %v995_v2 }
 0x2f4   : > { %v998_v5 = vpop.xlane.xlu1 %997 }
 0x2f5   : > { %1836 = vrsqrt.f32 %v1022_v3  ;;  %v1023_v6 = vadd.f32 1e-05, %v1015_v4  ;;  %v1016_v7 = vmul.f32 0.03125, %v998_v5 }
 0x2f7   : > { %1838 = vrsqrt.f32 %v1023_v6  ;;  %v1024_v8 = vadd.f32 1e-05, %v1016_v7  ;;  %v1828_v7 = vld [vmem:[%s2080_s29 + $0x8] sm:$0xff]  }
 0x2f8   : > { %v1004_v9 = vpop.xlane.xlu1 %1003  ;;  %v1001_v10 = vpop.xlane.xlu0 %1000 }
 0x2f9   : > { %1840 = vrsqrt.f32 %v1024_v8  ;;  %v1018_v11 = vmul.f32 0.03125, %v1004_v9  ;;  %v1017_v12 = vmul.f32 0.03125, %v1001_v10 }
 0x2fb   : > { %v1026_v13 = vadd.f32 1e-05, %v1018_v11  ;;  %v1025_v14 = vadd.f32 1e-05, %v1017_v12 }
 0x2fc   : > { %v1010_v15 = vpop.xlane.xlu1 %1009  ;;  %v1007_v16 = vpop.xlane.xlu0 %1006 }
 0x2fd   : > { %1842 = vrsqrt.f32 %v1026_v13  ;;  %v1020_v17 = vmul.f32 0.03125, %v1010_v15  ;;  %v1019_v18 = vmul.f32 0.03125, %v1007_v16 }
 0x2fe   : > { %1844 = vrsqrt.f32 %v1025_v14  ;;  %v1833_v14 = vld [vmem:[%s2234_s10 + $0x8] sm:$0xff]  }
 0x2ff   : > { %v1837_v20 = vpop.eup %1836  ;;  %v1028_v21 = vadd.f32 1e-05, %v1020_v17  ;;  %v1027_v23 = vadd.f32 1e-05, %v1019_v18 }
 0x300   : > { %v1013_v26 = vpop.xlane.xlu0 %1012  ;;  %v1038_v27 = vmul.f32 %v1837_v20, %v2082_v19  ;;  %v1177_v15 = vpop.permute.xlu1 %1176 }
 0x301   : > { %v1839_v28 = vpop.eup %1838  ;;  %1846 = vrsqrt.f32 %v1028_v21  ;;  %v1021_v29 = vmul.f32 0.03125, %v1013_v26 }
 0x302   : > { %1848 = vrsqrt.f32 %v1027_v23  ;;  %v1039_v31 = vmul.f32 %v1839_v28, %v2084_v22  ;;  %v1053_v32 = vmul.f32 %v1667_v24, %v1038_v27 }
 0x303   : > { %v1841_v33 = vpop.eup %1840  ;;  %v1029_v36 = vadd.f32 1e-05, %v1021_v29 }
 0x304   : > { %v1054_v37 = vmul.f32 %v1667_v24, %v1039_v31  ;;  %v1068_v38 = vadd.f32 %v1668_v30, %v1053_v32  ;;  %v1040_v39 = vmul.f32 %v1841_v33, %v2088_v25  ;;  %v1187_v16 = vpop.permute.xlu1 %1186  ;;  %v1681_v31 = vld [vmem:[%s2236_s12] ss:$0 sm:$0xff] }
 0x305   : > { %1850 = vrsqrt.f32 %v1029_v36 }
 0x306   : > { %v1069_v40 = vadd.f32 %v1668_v30, %v1054_v37  ;;  %v1076_v19 = vmax.f32 %v1068_v38, 0.0  ;;  %v1055_v41 = vmul.f32 %v1667_v24, %v1040_v39 }
 0x307   : > { %v1843_v42 = vpop.eup %1842 }
 0x308   : > { %v1845_v45 = vpop.eup %1844  ;;  %v1077_v46 = vmax.f32 %v1069_v40, 0.0  ;;  %1092 = vst.msk [vmem:[#allocation2] sm:$0xff] %vm940_vm2, %v1076_v19  ;;  %v1070_v47 = vadd.f32 %v1668_v30, %v1055_v41  ;;  %v1042_v48 = vmul.f32 %v1843_v42, %v2098_v35  ;;  %v1192_v20 = vpop.permute.xlu1 %1191 }
 0x309   : > { %v1041_v22 = vmul.f32 %v1845_v45, %v2096_v34  ;;  %v1182_v23 = vpop.permute.xlu0 %1181 }
 0x30a   : > { %1093 = vst.msk [vmem:[#allocation2 + $0x8] sm:$0xff] %vm940_vm2, %v1077_v46  ;;  %v1105_v49 = vpack.c.bf16 %v1077_v46, %v1076_v19  ;;  %v1078_v50 = vmax.f32 %v1070_v47, 0.0  ;;  %v1057_v52 = vmul.f32 %v1667_v24, %v1042_v48 }
 0x30b   : > { %v1847_v25 = vpop.eup %1846  ;;  %v1056_v53 = vmul.f32 %v1667_v24, %v1041_v22 }
 0x30c   : > { %v1849_v54 = vpop.eup %1848  ;;  %1763 = vmatprep.subr.bf16.mxu0 %v1105_v49  ;;  %1094 = vst.msk [vmem:[#allocation2 + $0x10] sm:$0xff] %vm940_vm2, %v1078_v50  ;;  %v1072_v55 = vadd.f32 %v1668_v30, %v1057_v52  ;;  %v1044_v56 = vmul.f32 %v1847_v25, %v2105_v43 }
 0x30d   : > { %1764 = vmatpush3.bf16.msra.mxu0 %v1105_v49  ;;  %v1071_v57 = vadd.f32 %v1668_v30, %v1056_v53  ;;  %v1043_v35 = vmul.f32 %v1849_v54, %v2107_v44 }
 0x30e   : > { %v1080_v58 = vmax.f32 %v1072_v55, 0.0  ;;  %v1059_v34 = vmul.f32 %v1667_v24, %v1044_v56 }
 0x30f   : > { %v1851_v59 = vpop.eup %1850  ;;  %v1079_v60 = vmax.f32 %v1071_v57, 0.0  ;;  %v1058_v61 = vmul.f32 %v1667_v24, %v1043_v35 }
 0x310   : > { %1096 = vst.msk [vmem:[#allocation2 + $0x20] sm:$0xff] %vm940_vm2, %v1080_v58  ;;  %v1045_v62 = vmul.f32 %v1851_v59, %v2115_v51  ;;  %v1074_v0 = vadd.f32 %v1668_v30, %v1059_v34 }
 0x311   : > { %1095 = vst.msk [vmem:[#allocation2 + $0x18] sm:$0xff] %vm940_vm2, %v1079_v60  ;;  %v1106_v1 = vpack.c.bf16 %v1079_v60, %v1078_v50  ;;  %v1073_v2 = vadd.f32 %v1668_v30, %v1058_v61 }
 0x312   : > { %v1060_v43 = vmul.f32 %v1667_v24, %v1045_v62  ;;  %v1082_v3 = vmax.f32 %v1074_v0, 0.0 }
 0x313   : > { %1765 = vmatprep.subr.bf16.mxu0 %v1106_v1  ;;  %v1081_v44 = vmax.f32 %v1073_v2, 0.0  ;;  %v1835_v2 = vld [vmem:[%s2239_s15 + $0x8] sm:$0xff]  }
 0x314   : > { %1766 = vmatpush3.bf16.msra.mxu0 %v1106_v1  ;;  %v1075_v4 = vadd.f32 %v1668_v30, %v1060_v43  ;;  %1098 = vst.msk [vmem:[#allocation2 + $0x30] sm:$0xff] %vm940_vm2, %v1082_v3  ;;  %v1834_v1 = vld [vmem:[%s2239_s15] sm:$0xff]  }
 0x315   : > { %1097 = vst.msk [vmem:[#allocation2 + $0x28] sm:$0xff] %vm940_vm2, %v1081_v44  ;;  %v1107_v5 = vpack.c.bf16 %v1081_v44, %v1080_v58 }
 0x316   : > { %v1083_v6 = vmax.f32 %v1075_v4, 0.0 }
 0x317   : > { %1767 = vmatprep.subr.bf16.mxu0 %v1107_v5 }
 0x318   : > { %1768 = vmatpush3.bf16.msra.mxu0 %v1107_v5  ;;  %1099 = vst.msk [vmem:[#allocation2 + $0x38] sm:$0xff] %vm940_vm2, %v1083_v6  ;;  %v1108_v51 = vpack.c.bf16 %v1083_v6, %v1082_v3 }
 0x31a   : > { %1769 = vmatprep.subr.bf16.mxu0 %v1108_v51 }
 0x31c   : > { %1770 = vmatpush3.bf16.msra.mxu0 %v1108_v51 }
 0x31d   : > { %1791 = vmatprep.subr.bf16.mxu0 %v1834_v1 }
 0x31f   : > { %1772 = vmatmul.mubr.msk.bf16.vlgmr.msra.gmra.mrb[8].mxu0 %vm624_vm0, %v1828_v7  ;;  %v1101_v8 = vld [vmem:[%s1100_s22] sm:$0xff]  ;;  %v1102_v9 = vld [vmem:[%s1100_s22 + $0x8] sm:$0xff]  ;;  %v1103_v10 = vld [vmem:[%s1100_s22 + $0x10] sm:$0xff] }
 0x320   : > { %v1198_v11 = vpack.c.bf16 %v1102_v9, %v1101_v8  ;;  %v1104_v12 = vld [vmem:[%s1100_s22 + $0x18] sm:$0xff]  ;;  %1792 = vmatpush3.bf16.msra.mxu0 %v1834_v1 }
 0x321   : > { %v1199_v13 = vpack.c.bf16 %v1104_v12, %v1103_v10  ;;  %1793 = vmatprep.subr.bf16.mxu0 %v1835_v2 }
 0x322   : > { %1779 = vmatprep.mubr.msk.bf16.mxu1 %vm940_vm2, %v1198_v11 }
 0x323   : > { %1780 = vmatmul.mubr.msk.bf16.vlgmr.msra.gmra.mrb[8].mxu1 %vm940_vm2, %v1199_v13  ;;  %v1682_v13 = vld [vmem:[%s2237_s13] ss:$0 sm:$0xff] }
 0x324   : > { %1784 = vmatpush3.bf16.msra.mxu1 %v2139_v63  ;;  %1794 = vmatpush3.bf16.msra.mxu0 %v1835_v2 }
 0x325   : > { %1785 = vmatprep.subr.bf16.mxu1 %v1833_v14 }
 0x328   : > { %1786 = vmatpush3.bf16.msra.mxu1 %v1833_v14 }
 0x3f2   : > { %v1773_v17 = vpop.f32.mrb[8].mxu0 }
 0x3f3   : > { %v1159_v18 = vpop.f32.mrb[9].mxu0  ;;  %v1196_v24 = vmul.f32 %v1773_v17, %v1187_v16  ;;  %v1683_v16 = vld [vmem:[%s2238_s14] ss:$0 sm:$0xff] }
 0x3f4   : > { %v1774_v21 = vpop.f32.mrb[10].mxu0  ;;  %v1194_v28 = vmul.f32 %v1177_v15, %v1159_v18 }
 0x3f5   : > { %v1197_v26 = vmul.f32 %v1774_v21, %v1192_v20  ;;  %v1162_v27 = vpop.f32.mrb[11].mxu0 }
 0x3f6   : > { %v1195_v29 = vmul.f32 %v1182_v23, %v1162_v27 }
 0x3f7   : > { %v1201_v30 = vpack.c.bf16 %v1197_v26, %v1196_v24 }
 0x3f8   : > { %v1200_v63 = vpack.c.bf16 %v1195_v29, %v1194_v28 }
 0x3fa   : > { %1787 = vmatprep.mubr.msk.bf16.mxu1 %vm940_vm2, %v1200_v63 }
 0x3fb   : > { %1788 = vmatmul.mubr.msk.bf16.vlgmr.msra.gmra.mrb[8].mxu1 %vm940_vm2, %v1201_v30 }
 0x4ce   : > { %v1789_v32 = vpop.f32.mrb[8].mxu1 }
 0x4cf   : > { %v1329_v33 = vpop.f32.mrb[9].mxu1  ;;  %v1353_v39 = vadd.f32 %v1789_v32, %v1681_v31 }
 0x4d0   : > { %v1351_v36 = vadd.f32 %v1681_v31, %v1329_v33  ;;  %v1790_v37 = vpop.f32.mrb[10].mxu1 }
 0x4d1   : > { %v1332_v38 = vpop.f32.mrb[11].mxu1  ;;  %v1354_v42 = vadd.f32 %v1790_v37, %v1681_v31  ;;  %v1361_v45 = vsel %vm940_vm2, %v1353_v39, 0.0 }
 0x4d2   : > { %v1352_v40 = vadd.f32 %v1681_v31, %v1332_v38  ;;  %v1355_v19 = vsel %vm940_vm2, %v1351_v36, 0.0 }
 0x4d3   : > { %1356 = vadd.xlane.f32.xlu0 %v1355_v19  ;;  %v1364_v46 = vsel %vm940_vm2, %v1354_v42, 0.0 }
 0x4d4   : > { %v1358_v41 = vsel %vm940_vm2, %v1352_v40, 0.0 }
 0x4d5   : > { %1359 = vadd.xlane.f32.xlu1 %v1358_v41 }
 0x4d7   : > { %1362 = vadd.xlane.f32.xlu0 %v1361_v45 }
 0x4db   : > { %1365 = vadd.xlane.f32.xlu0 %v1364_v46 }
 0x560   : > { %v1357_v47 = vpop.xlane.xlu0 %1356 }
 0x561   : > { %v1367_v48 = vmul.f32 0.03125, %v1357_v47 }
 0x562   : > { %v1360_v22 = vpop.xlane.xlu1 %1359 }
 0x563   : > { %v1371_v49 = vsub.f32 %v1351_v36, %v1367_v48  ;;  %v1368_v50 = vmul.f32 0.03125, %v1360_v22 }
 0x564   : > { %v1363_v52 = vpop.xlane.xlu0 %1362 }
 0x565   : > { %v1372_v25 = vsub.f32 %v1352_v40, %v1368_v50  ;;  %v1369_v53 = vmul.f32 0.03125, %v1363_v52  ;;  %v1375_v54 = vmul.f32 %v1371_v49, %v1371_v49  ;;  %v1684_v40 = vld [vmem:[%s2240_s16] ss:$0 sm:$0xff] }
 0x567   : > { %v1373_v55 = vsub.f32 %v1353_v39, %v1369_v53  ;;  %v1379_v56 = vsel %vm940_vm2, %v1375_v54, 0.0  ;;  %v1376_v57 = vmul.f32 %v1372_v25, %v1372_v25 }
 0x568   : > { %v1366_v35 = vpop.xlane.xlu0 %1365  ;;  %1380 = vadd.xlane.f32.xlu1 %v1379_v56 }
 0x569   : > { %v1370_v58 = vmul.f32 0.03125, %v1366_v35  ;;  %v1382_v34 = vsel %vm940_vm2, %v1376_v57, 0.0  ;;  %v1377_v59 = vmul.f32 %v1373_v55, %v1373_v55 }
 0x56a   : > { %1383 = vadd.xlane.f32.xlu0 %v1382_v34 }
 0x56b   : > { %v1374_v60 = vsub.f32 %v1354_v42, %v1370_v58  ;;  %v1385_v61 = vsel %vm940_vm2, %v1377_v59, 0.0 }
 0x56c   : > { %1386 = vadd.xlane.f32.xlu1 %v1385_v61 }
 0x56d   : > { %v1378_v62 = vmul.f32 %v1374_v60, %v1374_v60 }
 0x56f   : > { %v1388_v0 = vsel %vm940_vm2, %v1378_v62, 0.0 }
 0x570   : > { %1389 = vadd.xlane.f32.xlu0 %v1388_v0 }
 0x5f5   : > { %v1381_v43 = vpop.xlane.xlu1 %1380 }
 0x5f6   : > { %v1391_v3 = vmul.f32 0.03125, %v1381_v43 }
 0x5f7   : > { %v1384_v44 = vpop.xlane.xlu0 %1383 }
 0x5f8   : > { %v1395_v4 = vadd.f32 1e-05, %v1391_v3  ;;  %v1392_v5 = vmul.f32 0.03125, %v1384_v44 }
 0x5f9   : > { %v1387_v6 = vpop.xlane.xlu1 %1386 }
 0x5fa   : > { %1852 = vrsqrt.f32 %v1395_v4  ;;  %v1396_v51 = vadd.f32 1e-05, %v1392_v5  ;;  %v1393_v7 = vmul.f32 0.03125, %v1387_v6 }
 0x5fc   : > { %1854 = vrsqrt.f32 %v1396_v51  ;;  %v1397_v8 = vadd.f32 1e-05, %v1393_v7 }
 0x5fd   : > { %v1390_v9 = vpop.xlane.xlu0 %1389 }
 0x5fe   : > { %1856 = vrsqrt.f32 %v1397_v8  ;;  %v1394_v10 = vmul.f32 0.03125, %v1390_v9 }
 0x600   : > { %v1398_v11 = vadd.f32 1e-05, %v1394_v10 }
 0x602   : > { %1858 = vrsqrt.f32 %v1398_v11 }
 0x604   : > { %v1853_v12 = vpop.eup %1852 }
 0x605   : > { %v1403_v14 = vmul.f32 %v1853_v12, %v1371_v49 }
 0x606   : > { %v1855_v15 = vpop.eup %1854 }
 0x607   : > { %v1404_v17 = vmul.f32 %v1855_v15, %v1372_v25  ;;  %v1414_v18 = vmul.f32 %v1682_v13, %v1403_v14 }
 0x608   : > { %v1857_v20 = vpop.eup %1856 }
 0x609   : > { %v1405_v21 = vmul.f32 %v1857_v20, %v1373_v55  ;;  %v1415_v23 = vmul.f32 %v1682_v13, %v1404_v17  ;;  %v1425_v24 = vadd.f32 %v1683_v16, %v1414_v18 }
 0x60b   : > { %v1416_v26 = vmul.f32 %v1682_v13, %v1405_v21  ;;  %v1426_v27 = vadd.f32 %v1683_v16, %v1415_v23  ;;  %v1429_v30 = vmax.f32 %v1425_v24, 0.0 }
 0x60c   : > { %v1859_v28 = vpop.eup %1858 }
 0x60d   : > { %v1406_v29 = vmul.f32 %v1859_v28, %v1374_v60  ;;  %v1430_v63 = vmax.f32 %v1426_v27, 0.0  ;;  %v1427_v33 = vadd.f32 %v1683_v16, %v1416_v26 }
 0x60f   : > { %v1417_v31 = vmul.f32 %v1682_v13, %v1406_v29  ;;  %v1433_v32 = vpack.c.bf16 %v1430_v63, %v1429_v30  ;;  %v1431_v37 = vmax.f32 %v1427_v33, 0.0 }
 0x611   : > { %1795 = vmatprep.mubr.msk.bf16.mxu0 %vm940_vm2, %v1433_v32  ;;  %v1428_v36 = vadd.f32 %v1683_v16, %v1417_v31 }
 0x613   : > { %v1432_v38 = vmax.f32 %v1428_v36, 0.0 }
 0x615   : > { %v1434_v39 = vpack.c.bf16 %v1432_v38, %v1431_v37 }
 0x617   : > { %1796 = vmatmul.mubr.msk.bf16.vlgmr.msra.gmra.mrb[12].mxu0 %vm940_vm2, %v1434_v39 }
 0x6ea   : > { %v1797_v19 = vpop.f32.mrb[12].mxu0 }
 0x6eb   : > { %v1498_v41 = vpop.f32.mrb[13].mxu0  ;;  %v1507_v47 = vadd.f32 %v1797_v19, %v1684_v40 }
 0x6ec   : > { %v1499_v42 = vadd.f32 %v1684_v40, %v1498_v41  ;;  %v1798_v45 = vpop.f32.mrb[14].mxu0 }
 0x6ed   : > { %v1501_v46 = vpop.f32.mrb[15].mxu0  ;;  %v1510_v49 = vadd.f32 %v1798_v45, %v1684_v40  ;;  %v1520_v52 = vsel %vm1513_vm3, %v1507_v47, -inf }
 0x6ee   : > { %v1502_v48 = vadd.f32 %v1684_v40, %v1501_v46  ;;  %v1514_v22 = vsel %vm1513_vm3, %v1499_v42, -inf }
 0x6ef   : > { %1515 = vmax.xlane.f32.xlu1 %v1514_v22  ;;  %v1523_v25 = vsel %vm1513_vm3, %v1510_v49, -inf }
 0x6f0   : > { %v1517_v50 = vsel %vm1513_vm3, %v1502_v48, -inf }
 0x6f1   : > { %1518 = vmax.xlane.f32.xlu0 %v1517_v50 }
 0x6f3   : > { %1521 = vmax.xlane.f32.xlu1 %v1520_v52 }
 0x6f5   : > { %1524 = vmax.xlane.f32.xlu0 %v1523_v25 }
 0x77c   : > { %v1516_v53 = vpop.xlane.xlu1 %1515 }
 0x77d   : > { %v1526_v54 = vsub.f32 %v1499_v42, %v1516_v53 }
 0x77e   : > { %v1519_v55 = vpop.xlane.xlu0 %1518 }
 0x77f   : > { %v1530_v56 = vmul.f32 1.442695, %v1526_v54  ;;  %v1527_v57 = vsub.f32 %v1502_v48, %v1519_v55 }
 0x780   : > { %v1522_v35 = vpop.xlane.xlu1 %1521 }
 0x781   : > { %1860 = vpow2.f32 %v1530_v56  ;;  %v1532_v58 = vmul.f32 1.442695, %v1527_v57  ;;  %v1528_v34 = vsub.f32 %v1507_v47, %v1522_v35 }
 0x782   : > { %v1525_v59 = vpop.xlane.xlu0 %1524 }
 0x783   : > { %1862 = vpow2.f32 %v1532_v58  ;;  %v1534_v60 = vmul.f32 1.442695, %v1528_v34  ;;  %v1529_v61 = vsub.f32 %v1510_v49, %v1525_v59 }
 0x785   : > { %1864 = vpow2.f32 %v1534_v60  ;;  %v1536_v62 = vmul.f32 1.442695, %v1529_v61 }
 0x787   : > { %1866 = vpow2.f32 %v1536_v62 }
 0x78b   : > { %v1861_v0 = vpop.eup %1860 }
 0x78c   : > { %v1538_v1 = vsel %vm1513_vm3, %v1861_v0, 0.0 }
 0x78d   : > { %v1863_v2 = vpop.eup %1862  ;;  %1539 = vadd.xlane.f32.xlu1 %v1538_v1 }
 0x78e   : > { %v1541_v43 = vsel %vm1513_vm3, %v1863_v2, 0.0 }
 0x78f   : > { %v1865_v3 = vpop.eup %1864  ;;  %1542 = vadd.xlane.f32.xlu0 %v1541_v43 }
 0x790   : > { %v1544_v44 = vsel %vm1513_vm3, %v1865_v3, 0.0 }
 0x791   : > { %v1867_v4 = vpop.eup %1866  ;;  %1545 = vadd.xlane.f32.xlu1 %v1544_v44 }
 0x792   : > { %v1547_v5 = vsel %vm1513_vm3, %v1867_v4, 0.0 }
 0x793   : > { %1548 = vadd.xlane.f32.xlu0 %v1547_v5 }
 0x81a   : > { %v1540_v6 = vpop.xlane.xlu1 %1539 }
 0x81b   : > { %1868 = vlog2.f32 %v1540_v6 }
 0x81c   : > { %v1543_v51 = vpop.xlane.xlu0 %1542 }
 0x81d   : > { %1870 = vlog2.f32 %v1543_v51 }
 0x81e   : > { %v1546_v7 = vpop.xlane.xlu1 %1545 }
 0x81f   : > { %1872 = vlog2.f32 %v1546_v7 }
 0x820   : > { %v1549_v8 = vpop.xlane.xlu0 %1548 }
 0x821   : > { %1874 = vlog2.f32 %v1549_v8 }
 0x825   : > { %v1869_v9 = vpop.eup %1868 }
 0x826   : > { %v1551_v10 = vmul.f32 0.6931472, %v1869_v9 }
 0x827   : > { %v1871_v11 = vpop.eup %1870 }
 0x828   : > { %v1558_v12 = vsub.f32 %v1526_v54, %v1551_v10  ;;  %v1553_v13 = vmul.f32 0.6931472, %v1871_v11 }
 0x829   : > { %v1873_v14 = vpop.eup %1872 }
 0x82a   : > { %1562 = vst.msk [vmem:[%s572_s30] sm:$0xff] %vm1513_vm3, %v1558_v12  ;;  %v1559_v15 = vsub.f32 %v1527_v57, %v1553_v13  ;;  %v1555_v16 = vmul.f32 0.6931472, %v1873_v14 }
 0x82b   : > { %v1875_v17 = vpop.eup %1874 }
 0x82c   : > { %1563 = vst.msk [vmem:[%s572_s30 + $0x8] sm:$0xff] %vm1513_vm3, %v1559_v15  ;;  %v1560_v18 = vsub.f32 %v1528_v34, %v1555_v16  ;;  %v1557_v20 = vmul.f32 0.6931472, %v1875_v17 }
 0x82e   : > { %1564 = vst.msk [vmem:[%s572_s30 + $0x10] sm:$0xff] %vm1513_vm3, %v1560_v18  ;;  %v1561_v21 = vsub.f32 %v1529_v61, %v1557_v20 }
 0x830   : > { %1565 = vst.msk [vmem:[%s572_s30 + $0x18] sm:$0xff] %vm1513_vm3, %v1561_v21 }
 0x831 PF: > { %s27_s24 = sadd.s32 1, %s1882_s24  }
 0x832   : > { %p24_p4 = scmp.ge.s32.totalorder %s27_s24, 4  }
 0x834   :  { %26 = sbr.rel (!%p24_p4) target bundleno = 3 (0x3), region = 122 }

</bundles_post_ra>
